<compile_context>
chip_gen: v7x
topology: tpu7x:2x2x1
jax: 0.10.0
libtpu: 0.0.40
codegen_flags: <defaults>
</compile_context>

<pallas_src>
import functools

import jax
import jax.numpy as jnp
from jax.experimental import pallas as pl
from jax.experimental.pallas import tpu as pltpu


def _round_up(x, m):
    return (x + m - 1) // m * m


def _starspace_kernel(x_ref, w_ref, p_ref, o_ref, *, d_emb, eps):
    # x_ref: (tb, K_pad)   w_ref: (K_pad, N_pad)
    # p_ref: (8, N_pad)    rows: 0=bias, 1=gamma, 2=beta, 3..7=padding
    # o_ref: (tb, N_pad)
    x = x_ref[...].astype(jnp.float32)
    w = w_ref[...].astype(jnp.float32)
    p = p_ref[...].astype(jnp.float32)
    bias = p[0:1, :]
    gamma = p[1:2, :]
    beta = p[2:3, :]

    # Linear: y = x @ W + b  (MXU matmul, f32 accumulation).
    y = jnp.dot(x, w, preferred_element_type=jnp.float32) + bias

    n_pad = y.shape[-1]
    inv_n = 1.0 / d_emb

    if d_emb == n_pad:
        # No lane padding -> plain reductions.
        mean = jnp.sum(y, axis=-1, keepdims=True) * inv_n
        centered = y - mean
    else:
        # Mask padded lanes so they do not corrupt mean / variance.
        col = jax.lax.broadcasted_iota(jnp.int32, (1, n_pad), 1)
        mask = (col < d_emb).astype(jnp.float32)
        mean = jnp.sum(y * mask, axis=-1, keepdims=True) * inv_n
        centered = (y - mean) * mask

    var = jnp.sum(centered * centered, axis=-1, keepdims=True) * inv_n
    y_norm = centered * jax.lax.rsqrt(var + eps)

    out = y_norm * gamma + beta
    o_ref[...] = out.astype(o_ref.dtype)


def fused_linear_layernorm(branches, *, eps=1e-5):
    """Run LayerNorm(x @ W + b) * gamma + beta for several branches in ONE
    pallas_call.

    branches: list of dicts with keys x:(B_g, d_in_g), w:(d_in_g, d_emb),
    b/gamma/beta:(d_emb,).  Returns a list of (B_g, d_emb) arrays.
    """
    G = len(branches)
    d_emb = branches[0]["w"].shape[1]
    dtype = branches[0]["x"].dtype

    # Lane-dense / sublane-aligned padded shapes.
    K_pad = _round_up(max(br["x"].shape[1] for br in branches), 128)
    N_pad = _round_up(d_emb, 128)
    B_list = [br["x"].shape[0] for br in branches]
    Bp = _round_up(max(B_list), 8)
    tb = min(Bp, 512)            # VMEM-filling batch tiles once B scales up
    Bp = _round_up(Bp, tb)

    # Stack (and zero-pad) all branches: zero-padded K columns / rows do not
    # change x @ W; padded batch rows and padded lanes are sliced off below.
    x_stack = jnp.zeros((G, Bp, K_pad), dtype)
    w_stack = jnp.zeros((G, K_pad, N_pad), dtype)
    p_stack = jnp.zeros((G, 8, N_pad), dtype)   # rows: bias, gamma, beta
    for g, br in enumerate(branches):
        B_g, d_in_g = br["x"].shape
        x_stack = x_stack.at[g, :B_g, :d_in_g].set(br["x"].astype(dtype))
        w_stack = w_stack.at[g, :d_in_g, :d_emb].set(br["w"].astype(dtype))
        p_stack = p_stack.at[g, 0, :d_emb].set(br["b"].astype(dtype))
        p_stack = p_stack.at[g, 1, :d_emb].set(br["gamma"].astype(dtype))
        p_stack = p_stack.at[g, 2, :d_emb].set(br["beta"].astype(dtype))

    grid = (G, Bp // tb)
    kernel = functools.partial(_starspace_kernel, d_emb=d_emb, eps=eps)

    # Explicit VMEM budget: double-buffered x/out + resident w/params (+margin),
    # clamped below v7x's 64 MiB physical VMEM.
    tile_bytes = 4 * (2 * tb * K_pad + 2 * K_pad * N_pad + 2 * 8 * N_pad + 2 * tb * N_pad)
    vmem_limit = int(min(max(2 * tile_bytes, 4 << 20), 48 << 20))

    out = pl.pallas_call(
        kernel,
        out_shape=jax.ShapeDtypeStruct((G, Bp, N_pad), dtype),
        grid_spec=pltpu.PrefetchScalarGridSpec(
            num_scalar_prefetch=0,
            grid=grid,
            in_specs=[
                pl.BlockSpec((None, tb, K_pad), lambda g, i: (g, i, 0)),
                pl.BlockSpec((None, K_pad, N_pad), lambda g, i: (g, 0, 0)),
                pl.BlockSpec((None, 8, N_pad), lambda g, i: (g, 0, 0)),
            ],
            out_specs=pl.BlockSpec((None, tb, N_pad), lambda g, i: (g, i, 0)),
        ),
        compiler_params=pltpu.CompilerParams(
            dimension_semantics=("parallel", "parallel"),
            vmem_limit_bytes=vmem_limit,
        ),
    )(x_stack, w_stack, p_stack)

    # Slice away batch / lane padding per branch.
    return [out[g, :B_list[g], :d_emb] for g in range(G)]


def init_starspace_params(key, d_in_input, d_in_output, d_embed, dtype=jnp.float32):
    """Deterministic synthetic parameters (shapes match nn.LazyLinear + LayerNorm)."""
    k1, k2, k3, k4 = jax.random.split(key, 4)

    def linear_init(kw, kb, fan_in, fan_out):
        bound_w = (1.0 / fan_in) ** 0.5
        w = jax.random.uniform(kw, (fan_in, fan_out), dtype, -bound_w, bound_w)
        b = jax.random.uniform(kb, (fan_out,), dtype, -bound_w, bound_w)
        return w, b

    w_in, b_in = linear_init(k1, k2, d_in_input, d_embed)
    w_out, b_out = linear_init(k3, k4, d_in_output, d_embed)
    return {
        "input": {
            "w": w_in, "b": b_in,
            "gamma": jnp.ones((d_embed,), dtype),
            "beta": jnp.zeros((d_embed,), dtype),
        },
        "output": {
            "w": w_out, "b": b_out,
            "gamma": jnp.ones((d_embed,), dtype),
            "beta": jnp.zeros((d_embed,), dtype),
        },
    }


def starspace_forward(params, input=None, output=None):
    """Mirrors StarSpace.forward: returns (input_repr, output_repr).

    When both branches are requested they are fused into one pallas_call."""
    branches = []
    order = []
    if input is not None:
        if input.ndim == 1:
            input = input[:, None]          # torch unsqueeze(-1)
        p = params["input"]
        branches.append({"x": input, "w": p["w"], "b": p["b"],
                         "gamma": p["gamma"], "beta": p["beta"]})
        order.append("input")
    if output is not None:
        if output.ndim == 1:
            output = output[:, None]
        p = params["output"]
        branches.append({"x": output, "w": p["w"], "b": p["b"],
                         "gamma": p["gamma"], "beta": p["beta"]})
        order.append("output")

    input_repr, output_repr = None, None
    if branches:
        results = fused_linear_layernorm(branches)
        for name, res in zip(order, results):
            if name == "input":
                input_repr = res
            else:
                output_repr = res
    return input_repr, output_repr


def _reference_linear_layernorm(x, w, b, gamma, beta, eps=1e-5):
    y = x @ w + b
    mean = jnp.mean(y, axis=-1, keepdims=True)
    var = jnp.mean((y - mean) ** 2, axis=-1, keepdims=True)
    return (y - mean) / jnp.sqrt(var + eps) * gamma + beta


if __name__ == "__main__":
    key = jax.random.PRNGKey(0)
    k_in, k_out, k_param = jax.random.split(key, 3)

    batch = 2
    d_in_input = 16     # input-branch feature dim (fixed by LazyLinear at 1st call)
    d_in_output = 24    # output-branch feature dim
    d_embed = 32

    x_in = jax.random.normal(k_in, (batch, d_in_input), jnp.float32)
    x_out = jax.random.normal(k_out, (batch, d_in_output), jnp.float32)

    params = init_starspace_params(k_param, d_in_input, d_in_output, d_embed)

    input_repr, output_repr = starspace_forward(params, input=x_in, output=x_out)
    jax.block_until_ready((input_repr, output_repr))

    # Correctness check against a pure-JAX reference.
    ref_in = _reference_linear_layernorm(
        x_in, params["input"]["w"], params["input"]["b"],
        params["input"]["gamma"], params["input"]["beta"])
    ref_out = _reference_linear_layernorm(
        x_out, params["output"]["w"], params["output"]["b"],
        params["output"]["gamma"], params["output"]["beta"])

    assert input_repr.shape == (batch, d_embed)
    assert output_repr.shape == (batch, d_embed)
    assert jnp.allclose(input_repr, ref_in, atol=1e-5, rtol=1e-5)
    assert jnp.allclose(output_repr, ref_out, atol=1e-5, rtol=1e-5)

    # Single-branch path (input only) also works through the same kernel.
    only_in, none_out = starspace_forward(params, input=x_in)
    jax.block_until_ready(only_in)
    assert none_out is None
    assert jnp.allclose(only_in, ref_in, atol=1e-5, rtol=1e-5)

    print("KERNEL_OK")
</pallas_src>

<mosaic_0001>
module attributes {stable_mosaic.version = 11 : i64} {
  func.func @_starspace_kernel(%arg0: i32, %arg1: i32, %arg2: memref<1x8x128xf32, #tpu.memory_space<vmem>>, %arg3: memref<1x128x128xf32, #tpu.memory_space<vmem>>, %arg4: memref<1x8x128xf32, #tpu.memory_space<vmem>>, %arg5: memref<1x8x128xf32, #tpu.memory_space<vmem>>) attributes {dimension_semantics = [#tpu.dimension_semantics<parallel>, #tpu.dimension_semantics<parallel>], iteration_bounds = array<i64: 2, 1>, scalar_prefetch = 0 : i64, scratch_operands = 0 : i64, tpu.core_type = #tpu.core_type<tc>, window_params = [{transform_indices = @transform_0, window_bounds = array<i64: 1, 8, 128>}, {transform_indices = @transform_1, window_bounds = array<i64: 1, 128, 128>}, {transform_indices = @transform_2, window_bounds = array<i64: 1, 8, 128>}, {transform_indices = @transform_3, window_bounds = array<i64: 1, 8, 128>}]} {
    %c0 = arith.constant 0 : index
    %c0_0 = arith.constant 0 : index
    %c0_1 = arith.constant 0 : index
    %0 = vector.load %arg2[%c0, %c0_0, %c0_1] : memref<1x8x128xf32, #tpu.memory_space<vmem>>, vector<1x8x128xf32>
    %1 = vector.shape_cast %0 : vector<1x8x128xf32> to vector<8x128xf32>
    %c0_2 = arith.constant 0 : index
    %c0_3 = arith.constant 0 : index
    %c0_4 = arith.constant 0 : index
    %2 = vector.load %arg3[%c0_2, %c0_3, %c0_4] : memref<1x128x128xf32, #tpu.memory_space<vmem>>, vector<1x128x128xf32>
    %3 = vector.shape_cast %2 : vector<1x128x128xf32> to vector<128x128xf32>
    %c0_5 = arith.constant 0 : index
    %c0_6 = arith.constant 0 : index
    %c0_7 = arith.constant 0 : index
    %4 = vector.load %arg4[%c0_5, %c0_6, %c0_7] : memref<1x8x128xf32, #tpu.memory_space<vmem>>, vector<1x8x128xf32>
    %5 = vector.shape_cast %4 : vector<1x8x128xf32> to vector<8x128xf32>
    %6 = vector.extract_strided_slice %5 {offsets = [0, 0], sizes = [1, 128], strides = [1, 1]} : vector<8x128xf32> to vector<1x128xf32>
    %7 = vector.extract_strided_slice %5 {offsets = [1, 0], sizes = [1, 128], strides = [1, 1]} : vector<8x128xf32> to vector<1x128xf32>
    %8 = vector.extract_strided_slice %5 {offsets = [2, 0], sizes = [1, 128], strides = [1, 1]} : vector<8x128xf32> to vector<1x128xf32>
    %cst = arith.constant dense<0.000000e+00> : vector<8x128xf32>
    %9 = tpu.matmul %1, %3, %cst {dimension_numbers = #tpu.dot_dimension_numbers<[1], [0], [0], [1], [0, 0, 1, 1], [], []>} : vector<8x128xf32>, vector<128x128xf32>, vector<8x128xf32> -> vector<8x128xf32>
    %10 = vector.broadcast %6 : vector<1x128xf32> to vector<8x128xf32>
    %11 = arith.addf %9, %10 : vector<8x128xf32>
    %12 = tpu.iota {dimensions = array<i32: 1>} : vector<1x128xi32>
    %c32_i32 = arith.constant 32 : i32
    %13 = vector.broadcast %c32_i32 : i32 to vector<1x128xi32>
    %14 = arith.cmpi slt, %12, %13 : vector<1x128xi32>
    %15 = arith.extui %14 : vector<1x128xi1> to vector<1x128xi32>
    %16 = arith.sitofp %15 : vector<1x128xi32> to vector<1x128xf32>
    %17 = vector.broadcast %16 : vector<1x128xf32> to vector<8x128xf32>
    %18 = arith.mulf %11, %17 : vector<8x128xf32>
    %cst_8 = arith.constant dense<0.000000e+00> : vector<8xf32>
    %19 = vector.multi_reduction <add>, %18, %cst_8 [1] : vector<8x128xf32> to vector<8xf32>
    %20 = vector.shape_cast %19 : vector<8xf32> to vector<8x1xf32>
    %cst_9 = arith.constant 3.125000e-02 : f32
    %21 = vector.broadcast %cst_9 : f32 to vector<8x1xf32>
    %22 = arith.mulf %20, %21 : vector<8x1xf32>
    %23 = vector.broadcast %22 : vector<8x1xf32> to vector<8x128xf32>
    %24 = arith.subf %11, %23 : vector<8x128xf32>
    %25 = vector.broadcast %16 : vector<1x128xf32> to vector<8x128xf32>
    %26 = arith.mulf %24, %25 : vector<8x128xf32>
    %27 = arith.mulf %26, %26 : vector<8x128xf32>
    %cst_10 = arith.constant dense<0.000000e+00> : vector<8xf32>
    %28 = vector.multi_reduction <add>, %27, %cst_10 [1] : vector<8x128xf32> to vector<8xf32>
    %29 = vector.shape_cast %28 : vector<8xf32> to vector<8x1xf32>
    %cst_11 = arith.constant 3.125000e-02 : f32
    %30 = vector.broadcast %cst_11 : f32 to vector<8x1xf32>
    %31 = arith.mulf %29, %30 : vector<8x1xf32>
    %cst_12 = arith.constant 9.99999974E-6 : f32
    %32 = vector.broadcast %cst_12 : f32 to vector<8x1xf32>
    %33 = arith.addf %31, %32 : vector<8x1xf32>
    %34 = math.rsqrt %33 : vector<8x1xf32>
    %35 = vector.broadcast %34 : vector<8x1xf32> to vector<8x128xf32>
    %36 = arith.mulf %26, %35 : vector<8x128xf32>
    %37 = vector.broadcast %7 : vector<1x128xf32> to vector<8x128xf32>
    %38 = arith.mulf %36, %37 : vector<8x128xf32>
    %39 = vector.broadcast %8 : vector<1x128xf32> to vector<8x128xf32>
    %40 = arith.addf %38, %39 : vector<8x128xf32>
    %c0_13 = arith.constant 0 : index
    %c0_14 = arith.constant 0 : index
    %c0_15 = arith.constant 0 : index
    %41 = vector.load %arg5[%c0_13, %c0_14, %c0_15] : memref<1x8x128xf32, #tpu.memory_space<vmem>>, vector<1x8x128xf32>
    %42 = vector.shape_cast %41 : vector<1x8x128xf32> to vector<8x128xf32>
    %43 = vector.shape_cast %40 : vector<8x128xf32> to vector<1x8x128xf32>
    tpu.vector_store %arg5[%c0_13, %c0_14, %c0_15], %43 {strides = array<i32>} : memref<1x8x128xf32, #tpu.memory_space<vmem>>, vector<1x8x128xf32>,
    return
  }
  func.func @transform_0(%arg0: i32, %arg1: i32) -> (i32, i32, i32) {
    %c0_i32 = arith.constant 0 : i32
    %c0_i32_0 = arith.constant 0 : i32
    return %arg0, %arg1, %c0_i32 : i32, i32, i32
  }
  func.func @transform_1(%arg0: i32, %arg1: i32) -> (i32, i32, i32) {
    %c0_i32 = arith.constant 0 : i32
    %c0_i32_0 = arith.constant 0 : i32
    %c0_i32_1 = arith.constant 0 : i32
    return %arg0, %c0_i32, %c0_i32_0 : i32, i32, i32
  }
  func.func @transform_2(%arg0: i32, %arg1: i32) -> (i32, i32, i32) {
    %c0_i32 = arith.constant 0 : i32
    %c0_i32_0 = arith.constant 0 : i32
    %c0_i32_1 = arith.constant 0 : i32
    return %arg0, %c0_i32, %c0_i32_0 : i32, i32, i32
  }
  func.func @transform_3(%arg0: i32, %arg1: i32) -> (i32, i32, i32) {
    %c0_i32 = arith.constant 0 : i32
    %c0_i32_0 = arith.constant 0 : i32
    return %arg0, %arg1, %c0_i32 : i32, i32, i32
  }
}

</mosaic_0001>

<bundles_post_ra>
// kernel: tpu_custom_call.1
= control target key start
LH: loop header
LB: loop body
LE: loop exit
PB: predicated region body
PF: predicated region fallthrough
CT: control target
= control target key end

     0   :  { %s1196_s0 = inlined_call_operand.hbm [shape: f32[2,8,128], index: 0, kind: input, shape index: {}]   ;;  %s1197_s1 = inlined_call_operand.hbm [shape: f32[2,128,128], index: 1, kind: input, shape index: {}]   ;;  %s1198_s2 = inlined_call_operand.hbm [shape: f32[2,8,128], index: 2, kind: input, shape index: {}]   ;;  %s1199_s3 = inlined_call_operand.hbm [shape: f32[2,8,128], index: 3, kind: output, shape index: {}]  }
   0x1   :  { %1206 = sst [smem:[#allocation15_spill]] %s1197_s1 }
   0x2   :  { %8 = vsyncpa [#allocation3], 0 }
   0x3   :  { %10 = vsyncpa [#allocation3 + $0x1], 0 }
   0x4   :  { %11 = vsyncpa [#allocation6], 0 }
   0x5   :  { %13 = vsyncpa [#allocation6 + $0x1], 0 }
   0x6   :  { %14 = vsyncpa [#allocation4], 0 }
   0x7   :  { %16 = vsyncpa [#allocation4 + $0x1], 0  ;;  %s920_s12 = smov 0   ;;  %s922_s13 = smov 0  }
   0x8   :  { %s924_s14 = smov 0   ;;  %s926_s15 = smov 0  }
   0x9   :  { %s928_s16 = smov 0   ;;  %s930_s17 = smov 0  }
   0xa LB: > { %1207 = sst [smem:[#allocation12_spill]] %s885_s16  ;;  %s951_s18 = sadd.s32 4294967295, %s889_s17   ;;  %s889_s17 = sphi %s930_s17, %s22_s17   ;;  %s885_s16 = sphi %s928_s16, %s1227_s16   ;;  %s881_s15 = sphi %s926_s15, %s1226_s15   ;;  %s877_s14 = sphi %s924_s14, %s1230_s14   ;;  %s873_s13 = sphi %s922_s13, %s1229_s13   ;;  %s869_s12 = sphi %s920_s12, %s1228_s12  }
   0xb   : > { %s537_s19 = sadd.s32 4294967294, %s889_s17   ;;  %s34_s20 = sadd.s32 1, %s885_s16 }
   0xc   : > { %s43_s21 = sadd.s32 1, %s877_s14  ;;  %p36_p0 = scmp.ge.s32.totalorder %s34_s20, 2 }
   0xd   : > { %p50_p1 = scmp.ne.s32.totalorder %s877_s14, %s873_s13  ;;  %p51_p2 = scmp.eq.s32.totalorder %s889_s17, 0 }
   0xe   : > { %p56_p3 = scmp.ne.s32.totalorder %s873_s13, %s869_s12  ;;  %s1232_s20 = smov (%p36_p0, %s34_s20), 0 }
   0xf   : > { %1208 = sst [smem:[#allocation13_spill]] %s1232_s20  ;;  %p963_p4 = por %p51_p2, %p50_p1 }
  0x10   : > { %p57_p5 = scmp.eq.s32.totalorder %s951_s18, 0  ;;  %s38_s23 = ssub.s32 %s885_s16, %s1232_s20 }
  0x11   : > { %p134_p6 = scmp.eq.s32.totalorder %s951_s18, 1  ;;  %p41_p7 = scmp.eq.s32.totalorder %s38_s23, 0 }
  0x12   : > { %p971_p8 = por %p57_p5, %p56_p3  ;;  %p140_p10 = scmp.eq.s32.totalorder %s537_s19, 1 }
  0x13   : > { %p975_p9 = por %p134_p6, %p50_p1  ;;  %p656_p13 = scmp.lt.s32.totalorder %s889_s17, 2 }
  0x14   : > { %s1210_s24 = scalar_select %p971_p8, 1, 0 }
  0x15   : > { %s1211_s25 = scalar_select %p975_p9, 1, 0 }
  0x16   : > { %s980_s26 = scalar_select %p41_p7, %s877_s14, %s43_s21  }
  0x17   : > { %p982_p11 = por %p140_p10, %p56_p3  ;;  %s989_s28 = sand.u32 1, %s877_s14  }
  0x18   : > { %1212 = sst [smem:[#allocation14_spill]] %s980_s26  ;;  %s179_s29 = sand.u32 1, %s889_s17  }
  0x19   : > { %s1213_s27 = scalar_select %p982_p11, 1, 0 }
  0x1a   : > { %s542_s30 = sshll.u32 %s989_s28, 7  ;;  %p995_p0 = pnand %p656_p13, %p963_p4 }
  0x1b   : > { %s557_s5 = sshll.u32 %s885_s16, 11  ;;  %s1215_s1 = sld [smem:[#allocation15_spill]] }
  0x1c   : > { %s1214_s4 = scalar_select %p995_p0, 1, 0 }
  0x1d   : > { %s183_s9 = scalar_lea.vmem [#allocation5], %s542_s30  ;;  %s1007_s11 = scalar_lea.sflag [#allocation6], %s179_s29 }
  0x1e   : > { %s190_s10 = sshll.u32 %s183_s9, 4  ;;  %p1013_p2 = pneg %p995_p0  ;;  %s1005_s10 = int_to_ptr.vmem [resolvable:$true] %s190_s10 }
  0x21   : > { %s1003_s8 = scalar_lea.hbm %s1215_s1, %s557_s5  ;;  %s718_s30 = scalar_lea.hbm %s1215_s1, 4096 }
  0x22   : > { %s713_s19 = scalar_lea.hbm %s1003_s8, 2048  ;;  %p719_p5 = scmp.lt.u32.totalorder %s1003_s8, %s1215_s1 }
  0x23   : > { %p714_p1 = scmp.ne.s32.totalorder %s1003_s8, %s713_s19  ;;  %p720_p6 = scmp.lt.u32.totalorder %s718_s30, %s713_s19 }
  0x24   : > { %p722_p10 = scmp.lt.u32.totalorder %s713_s19, %s1003_s8 }
  0x25   : > { %p716_p3 = pnand %p1013_p2, %p714_p1  ;;  %p721_p7 = por %p720_p6, %p719_p5 }
  0x27   : > { %p717_p4 = pneg %p716_p3  ;;  %p723_p13 = por %p722_p10, %p721_p7 }
  0x29   : > { %p724_p12 = pnand %p723_p13, %p717_p4 }
  0x2b   : > { %727 = shalt.err (!%p724_p12)
}
  0x2c   : > { %s728_s29 = scalar_lea.vmem %s1005_s10, 2048  ;;  %s891_s7 = smov [#allocation5]  }
  0x2d   : > { %p729_p1 = scmp.ne.s32.totalorder %s1005_s10, %s728_s29  ;;  %s733_s9 = sshll.u32 %s891_s7, 4  ;;  %s734_s9 = int_to_ptr.vmem [resolvable:$false] %s733_s9 }
  0x2e   : > { %s735_s22 = scalar_lea.vmem %s734_s9, 4096  ;;  %p736_p9 = scmp.lt.s32.totalorder %s1005_s10, %s734_s9 }
  0x2f   : > { %p731_p3 = pnand %p729_p1, %p1013_p2  ;;  %p737_p8 = scmp.lt.s32.totalorder %s735_s22, %s728_s29 }
  0x31   : > { %p732_p11 = pneg %p731_p3  ;;  %p738_p5 = por %p737_p8, %p736_p9 }
  0x33   : > { %p739_p6 = pnand %p738_p5, %p732_p11 }
  0x35   : > { %742 = shalt.err (!%p739_p6)
}
  0x36   : > { %s892_s19 = smov 128   ;;  %s893_s23 = smov 8  }
  0x37   : > { %648 = dma.hbm_to_vmem [thread:$0]  (!%p995_p0), %s1003_s8, 2048, %s1005_s10, %s1007_s11, %s892_s19, %s892_s19, %s893_s23  }
  0x38   : > { %p547_p12 = scmp.ge.s32.totalorder %s889_s17, 1  ;;  %p216_p4 = scmp.lt.s32.totalorder %s889_s17, 3 }
  0x39   : > { %s1204_s5 = sshll.u32 %s989_s28, 3  ;;  %s541_s6 = sshll.u32 %s885_s16, 7 }
  0x3a   : > { %p1039_p8 = pnand %p547_p12, %p216_p4  ;;  %s1048_s9 = scalar_lea.hbm %s1196_s0, %s541_s6 }
  0x3b   : > { %s164_s22 = scalar_lea.vmem [#allocation2], %s1204_s5  ;;  %s1057_s23 = scalar_lea.hbm %s1198_s2, %s541_s6 }
  0x3c   : > { %s1217_s30 = scalar_select %p1039_p8, 1, 0 }
  0x3d   : > { %s172_s8 = sshll.u32 %s164_s22, 4  ;;  %s161_s1 = scalar_lea.sflag [#allocation3], %s989_s28  ;;  %s1052_s8 = int_to_ptr.vmem [resolvable:$true] %s172_s8 }
  0x3e   : > { %s743_s20 = scalar_lea.hbm %s1048_s9, 128  ;;  %s748_s16 = scalar_lea.hbm %s1196_s0, 256 }
  0x3f   : > { %p744_p9 = scmp.ne.s32.totalorder %s1048_s9, %s743_s20  ;;  %p749_p10 = scmp.lt.u32.totalorder %s1048_s9, %s1196_s0 }
  0x40   : > { %p750_p13 = scmp.lt.u32.totalorder %s748_s16, %s743_s20  ;;  %p752_p3 = scmp.lt.u32.totalorder %s743_s20, %s1048_s9 }
  0x41   : > { %p746_p11 = pnand %p744_p9, %p1013_p2 }
  0x42   : > { %p751_p1 = por %p750_p13, %p749_p10 }
  0x43   : > { %p747_p7 = pneg %p746_p11 }
  0x44   : > { %p753_p5 = por %p752_p3, %p751_p1 }
  0x46   : > { %p754_p6 = pnand %p753_p5, %p747_p7 }
  0x48   : > { %757 = shalt.err (!%p754_p6)
}
  0x49   : > { %s758_s6 = scalar_lea.vmem %s1052_s8, 128  ;;  %s894_s22 = smov [#allocation2]  }
  0x4a   : > { %p759_p12 = scmp.ne.s32.totalorder %s1052_s8, %s758_s6  ;;  %s763_s10 = sshll.u32 %s894_s22, 4  ;;  %s764_s10 = int_to_ptr.vmem [resolvable:$false] %s763_s10 }
  0x4b   : > { %s765_s26 = scalar_lea.vmem %s764_s10, 256  ;;  %p766_p11 = scmp.lt.s32.totalorder %s1052_s8, %s764_s10 }
  0x4c   : > { %p761_p4 = pnand %p759_p12, %p1013_p2  ;;  %p767_p8 = scmp.lt.s32.totalorder %s765_s26, %s758_s6 }
  0x4e   : > { %p762_p9 = pneg %p761_p4  ;;  %p768_p10 = por %p767_p8, %p766_p11 }
  0x50   : > { %p769_p13 = pnand %p768_p10, %p762_p9 }
  0x52   : > { %772 = shalt.err (!%p769_p13)
}
  0x53   : > { %645 = dma.hbm_to_vmem [thread:$0]  (!%p995_p0), %s1048_s9, 128, %s1052_s8, %s161_s1  }
  0x54   : > { %s1218_s16 = sshll.u32 %s989_s28, 3  ;;  %s773_s19 = scalar_lea.hbm %s1057_s23, 128 }
  0x55   : > { %s204_s20 = scalar_lea.vmem [#allocation7], %s1218_s16  ;;  %p774_p7 = scmp.ne.s32.totalorder %s1057_s23, %s773_s19 }
  0x56   : > { %s211_s5 = sshll.u32 %s204_s20, 4  ;;  %s778_s6 = scalar_lea.hbm %s1198_s2, 256  ;;  %s212_s5 = int_to_ptr.vmem [resolvable:$true] %s211_s5 }
  0x57   : > { %p776_p8 = pnand %p774_p7, %p1013_p2  ;;  %p779_p3 = scmp.lt.u32.totalorder %s1057_s23, %s1198_s2 }
  0x58   : > { %p780_p5 = scmp.lt.u32.totalorder %s778_s6, %s773_s19  ;;  %p782_p12 = scmp.lt.u32.totalorder %s773_s19, %s1057_s23 }
  0x59   : > { %p777_p1 = pneg %p776_p8 }
  0x5a   : > { %p781_p6 = por %p780_p5, %p779_p3 }
  0x5c   : > { %p783_p4 = por %p782_p12, %p781_p6 }
  0x5e   : > { %p784_p9 = pnand %p783_p4, %p777_p1 }
  0x60   : > { %787 = shalt.err (!%p784_p9)
}
  0x61   : > { %s788_s1 = scalar_lea.vmem %s212_s5, 128  ;;  %s895_s28 = smov [#allocation7]  }
  0x62   : > { %p789_p11 = scmp.ne.s32.totalorder %s212_s5, %s788_s1  ;;  %s793_s9 = sshll.u32 %s895_s28, 4  ;;  %s794_s9 = int_to_ptr.vmem [resolvable:$false] %s793_s9 }
  0x63   : > { %s795_s8 = scalar_lea.vmem %s794_s9, 256  ;;  %p796_p7 = scmp.lt.s32.totalorder %s212_s5, %s794_s9 }
  0x64   : > { %p791_p10 = pnand %p789_p11, %p1013_p2  ;;  %p797_p8 = scmp.lt.s32.totalorder %s795_s8, %s788_s1 }
  0x66   : > { %p792_p13 = pneg %p791_p10  ;;  %p798_p0 = por %p797_p8, %p796_p7 }
  0x68   : > { %p799_p3 = pnand %p798_p0, %p792_p13 }
  0x6a   : > { %802 = shalt.err (!%p799_p3)
}
  0x6b   : > { %p1219_p5 = scmp.ne.s32.totalorder %s1214_s4, 0  ;;  %p1220_p1 = scmp.ne.s32.totalorder %s1217_s30, 0 }
  0x6c   : > { %s1104_s21 = sand.u32 (!%p1220_p1), 1, %s873_s13   ;;  %p1221_p0 = scmp.ne.s32.totalorder (!%p1220_p1), %s1210_s24, 0 }
  0x6d   : > { %651 = dma.hbm_to_vmem [thread:$0]  (!%p1219_p5), %s1057_s23, 128, %s212_s5, %s1007_s11  }
  0x6e   : > { %220 = sbr.rel (%p1220_p1) target bundleno = 698 (0x2ba), region = 32  ;;  %s1107_s26 = sshll.u32 (!%p1220_p1), %s1104_s21, 3 }
  0x6f   : > { %s223_s16 = scalar_lea.sflag (!%p1220_p1), [#allocation3], %s1104_s21  ;;  %s226_s20 = scalar_lea.vmem (!%p1220_p1), [#allocation2], %s1107_s26 }
  0x75   : > { %856 = dma.done.wait (%p1221_p0), %s223_s16, 128  }
  0x76   : > { %858 = vsyncadd (%p1221_p0), %s223_s16, 4294967168  ;;  %s231_s4 = sand.u32 1, %s951_s18   ;;  %s549_s11 = sshll.u32 %s1104_s21, 7 }
  0x77   : > { %s232_s30 = scalar_lea.sflag [#allocation6], %s231_s4  ;;  %s1117_s23 = scalar_lea.vmem [#allocation5], %s549_s11 }
  0x78   : > { %860 = dma.done.wait (%p1221_p0), %s232_s30, 2176  }
  0x79   : > { %862 = vsyncadd (%p1221_p0), %s232_s30, 4294965120  ;;  %v896_v0 = vmov 0.0|0.0   ;;  %vm897_vm0 = vmmov 0   ;;  %v898_v1 = vmov 0.0   ;;  %v278_v2 = vld [vmem:[%s1117_s23] sm:$0xff]  ;;  %v279_v3 = vld [vmem:[%s1117_s23 + $0x8] sm:$0xff]  ;;  %v295_v27 = vlaneseq }
  0x7a   : > { %610 = vmatprep.subr.bf16.mxu0 %v896_v0  ;;  %607 = vmatprep.mubr.msk.f32.mxu0 %vm897_vm0, %v898_v1  ;;  %v280_v4 = vld [vmem:[%s1117_s23 + $0x10] sm:$0xff]  ;;  %v611_v5 = vpack.c.bf16 %v279_v3, %v278_v2  ;;  %v281_v6 = vld [vmem:[%s1117_s23 + $0x18] sm:$0xff]  ;;  %v282_v8 = vld [vmem:[%s1117_s23 + $0x20] sm:$0xff]  ;;  %s244_s18 = scalar_lea.vmem [#allocation7], %s1107_s26  ;;  %s554_s24 = sshll.u32 %s881_s15, 7 }
  0x7b   : > { %v614_v7 = vpack.c.bf16 %v281_v6, %v280_v4  ;;  %v283_v9 = vld [vmem:[%s1117_s23 + $0x28] sm:$0xff]  ;;  %v284_v11 = vld [vmem:[%s1117_s23 + $0x30] sm:$0xff]  ;;  %v285_v12 = vld [vmem:[%s1117_s23 + $0x38] sm:$0xff]  ;;  %v296_v28 = vshrl.u32 %v295_v27, 7  ;;  %v370_v30 = vand.u32 127, %v295_v27  ;;  %s276_s5 = scalar_lea.vmem [#allocation8], %s1107_s26  ;;  %s1147_s6 = scalar_lea.hbm %s1199_s3, %s554_s24 }
  0x7c   : > { %612 = vmatpush3.bf16.msra.mxu0 %v611_v5  ;;  %v617_v10 = vpack.c.bf16 %v283_v9, %v282_v8  ;;  %v620_v13 = vpack.c.bf16 %v285_v12, %v284_v11  ;;  %v286_v14 = vld [vmem:[%s1117_s23 + $0x40] sm:$0xff]  ;;  %v287_v15 = vld [vmem:[%s1117_s23 + $0x48] sm:$0xff]  ;;  %v288_v17 = vld [vmem:[%s1117_s23 + $0x50] sm:$0xff]  ;;  %s413_s19 = sshll.u32 %s276_s5, 4  ;;  %s399_s22 = scalar_lea.sflag [#allocation4], %s1104_s21  ;;  %s1149_s19 = int_to_ptr.vmem [resolvable:$true] %s413_s19 }
  0x7d   : > { %613 = vmatprep.subr.bf16.mxu0 %v896_v0  ;;  %v623_v16 = vpack.c.bf16 %v287_v15, %v286_v14  ;;  %v289_v18 = vld [vmem:[%s1117_s23 + $0x58] sm:$0xff]  ;;  %v290_v20 = vld [vmem:[%s1117_s23 + $0x60] sm:$0xff]  ;;  %v291_v21 = vld [vmem:[%s1117_s23 + $0x68] sm:$0xff]  ;;  %v297_v29 = vsub.s32 0, %v296_v28  ;;  %vm371_vm1 = vcmp.lt.s32.totalorder %v370_v30, 32  ;;  %v389_v46 = vsub.s32 1, %v296_v28 }
  0x7e   : > { %v626_v19 = vpack.c.bf16 %v289_v18, %v288_v17  ;;  %v629_v22 = vpack.c.bf16 %v291_v21, %v290_v20  ;;  %v292_v23 = vld [vmem:[%s1117_s23 + $0x70] sm:$0xff]  ;;  %v293_v24 = vld [vmem:[%s1117_s23 + $0x78] sm:$0xff]  ;;  %v294_v31 = vld [vmem:[%s244_s18] sm:$0xff]  ;;  %v552_v34 = vsel %vm371_vm1, 1.0, %v898_v1  ;;  %v394_v47 = vsub.s32 2, %v296_v28  ;;  %s803_s10 = scalar_lea.vmem %s1149_s19, 128 }
  0x7f   : > { %v632_v25 = vpack.c.bf16 %v293_v24, %v292_v23  ;;  %v277_v26 = vld [vmem:[%s226_s20] sm:$0xff]  ;;  %v298_v32 = vrot.slane %v294_v31, %v297_v29  ;;  %v390_v48 = vrot.slane %v294_v31, %v389_v46  ;;  %p804_p2 = scmp.ne.s32.totalorder %s1149_s19, %s803_s10  ;;  %p1222_p6 = scmp.ne.s32.totalorder %s1211_s25, 0 }
  0x80   : > { %615 = vmatpush3.bf16.msra.mxu0 %v614_v7  ;;  %v395_v50 = vrot.slane %v294_v31, %v394_v47  ;;  %s899_s15 = smov [#allocation8]  }
  0x81   : > { %616 = vmatprep.subr.bf16.mxu0 %v896_v0  ;;  %p805_p12 = pnand %p804_p2, %p1222_p6  ;;  %s807_s1 = sshll.u32 %s899_s15, 4  ;;  %s808_s1 = int_to_ptr.vmem [resolvable:$false] %s807_s1 }
  0x82   : > { %s809_s28 = scalar_lea.vmem %s808_s1, 256  ;;  %p810_p9 = scmp.lt.s32.totalorder %s1149_s19, %s808_s1 }
  0x83   : > { %p806_p4 = pneg %p805_p12  ;;  %p811_p11 = scmp.lt.s32.totalorder %s809_s28, %s803_s10 }
  0x84   : > { %618 = vmatpush3.bf16.msra.mxu0 %v617_v10 }
  0x85   : > { %619 = vmatprep.subr.bf16.mxu0 %v896_v0  ;;  %p812_p10 = por %p811_p11, %p810_p9 }
  0x87   : > { %p813_p13 = pnand %p812_p10, %p806_p4 }
  0x88   : > { %621 = vmatpush3.bf16.msra.mxu0 %v620_v13 }
  0x89   : > { %622 = vmatprep.subr.bf16.mxu0 %v896_v0 }
  0x8c   : > { %624 = vmatpush3.bf16.msra.mxu0 %v623_v16 }
  0x8d   : > { %625 = vmatprep.subr.bf16.mxu0 %v896_v0 }
  0x90   : > { %627 = vmatpush3.bf16.msra.mxu0 %v626_v19 }
  0x91   : > { %628 = vmatprep.subr.bf16.mxu0 %v896_v0 }
  0x94   : > { %630 = vmatpush3.bf16.msra.mxu0 %v629_v22 }
  0x95   : > { %631 = vmatprep.subr.bf16.mxu0 %v896_v0 }
  0x98   : > { %633 = vmatpush3.bf16.msra.mxu0 %v632_v25 }
  0x9b   : > { %608 = vmatmul.mubr.f32.vlgmr.msra.gmra.mrb[0].mxu0 %v277_v26 }
 0x16e   : > { %v365_v33 = vpop.f32.mrb[0].mxu0 }
 0x16f   : > { %v366_v35 = vadd.f32 %v365_v33, %v298_v32  ;;  %v609_v36 = vpop.f32.mrb[1].mxu0 }
 0x171   : > { %v374_v37 = vmul.f32 %v552_v34, %v366_v35 }
 0x173   : > { %375 = vadd.xlane.f32.xlu0 %v374_v37 }
 0x200   : > { %v376_v38 = vpop.xlane.xlu0 %375 }
 0x201   : > { %v377_v39 = vmul.f32 0.03125, %v376_v38 }
 0x203   : > { %v378_v40 = vsub.f32 %v366_v35, %v377_v39 }
 0x205   : > { %v379_v41 = vmul.f32 %v552_v34, %v378_v40 }
 0x207   : > { %v380_v42 = vmul.f32 %v379_v41, %v379_v41 }
 0x209   : > { %381 = vadd.xlane.f32.xlu0 %v380_v42 }
 0x296   : > { %v382_v43 = vpop.xlane.xlu0 %381 }
 0x297   : > { %v383_v44 = vmul.f32 0.03125, %v382_v43 }
 0x299   : > { %v384_v45 = vadd.f32 1e-05, %v383_v44 }
 0x29b   : > { %711 = vrsqrt.f32 %v384_v45 }
 0x2a5   : > { %v712_v49 = vpop.eup %711 }
 0x2a6   : > { %v386_v51 = vmul.f32 %v712_v49, %v379_v41 }
 0x2a8   : > { %v391_v52 = vmul.f32 %v390_v48, %v386_v51 }
 0x2aa   : > { %v396_v53 = vadd.f32 %v395_v50, %v391_v52 }
 0x2ac   : > { %397 = vst [vmem:[%s276_s5] sm:$0xff] %v396_v53 }
 0x2ad   : > { %816 = shalt.err (!%p813_p13)
}
 0x2ae   : > { %s817_s9 = scalar_lea.hbm %s1147_s6, 128  ;;  %s821_s26 = scalar_lea.hbm %s1199_s3, 256 }
 0x2af   : > { %p818_p7 = scmp.ne.s32.totalorder %s1147_s6, %s817_s9  ;;  %p822_p5 = scmp.lt.u32.totalorder %s1147_s6, %s1199_s3 }
 0x2b0   : > { %p823_p1 = scmp.lt.u32.totalorder %s821_s26, %s817_s9  ;;  %p825_p2 = scmp.lt.u32.totalorder %s817_s9, %s1147_s6 }
 0x2b1   : > { %p819_p8 = pnand %p818_p7, %p1222_p6 }
 0x2b2   : > { %p824_p0 = por %p823_p1, %p822_p5 }
 0x2b3   : > { %p820_p3 = pneg %p819_p8 }
 0x2b4   : > { %p826_p12 = por %p825_p2, %p824_p0 }
 0x2b6   : > { %p827_p4 = pnand %p826_p12, %p820_p3 }
 0x2b8   : > { %830 = shalt.err (!%p827_p4)
}
 0x2b9   : > { %640 = dma.vmem_to_hbm [thread:$0]  (%p1222_p6), %s1149_s19, 128, %s1147_s6, %s399_s22  }
 0x2ba PF: > { %s425_s4 = sand.u32 1, %s869_s12   ;;  %p1223_p9 = scmp.ne.s32.totalorder %s1213_s27, 0 }
 0x2bb   : > { %p1224_p11 = scmp.ge.s32.totalorder %s889_s17, 2  ;;  %s426_s11 = scalar_lea.sflag [#allocation4], %s425_s4 }
 0x2bd   : > { %p653_p10 = pnand %p1224_p11, %p1223_p9 }
 0x2bf   : > { %864 = dma.done.wait (!%p653_p10), %s426_s11, 128  }
 0x2c0   : > { %866 = vsyncadd (!%p653_p10), %s426_s11, 4294967168  ;;  %s22_s17 = sadd.s32 1, %s889_s17   ;;  %s1225_s25 = sld [smem:[#allocation14_spill]] }
 0x2c1   : > { %p19_p13 = scmp.ge.s32.totalorder %s22_s17, 4   ;;  %s1226_s15 = sld [smem:[#allocation12_spill]] }
 0x2c2   : > { %s1227_s16 = sld [smem:[#allocation13_spill]]  ;;  %s1228_s12 = smov %s873_s13 }
 0x2c3   : > { %s1229_s13 = smov %s877_s14  ;;  %21 = sbr.rel (!%p19_p13) target bundleno = 10 (0xa), region = 101 }
 0x2c6   : > { %s1230_s14 = smov %s1225_s25 }
 0x2ca   :  { %431 = vsyncpa [#allocation3], 1 }
 0x2cb   :  { %433 = vsyncpa [#allocation3 + $0x1], 1 }
 0x2cc   :  { %434 = vsyncpa [#allocation6], 1 }
 0x2cd   :  { %436 = vsyncpa [#allocation6 + $0x1], 1 }
 0x2ce   :  { %437 = vsyncpa [#allocation4], 1 }
 0x2cf   :  { %439 = vsyncpa [#allocation4 + $0x1], 1 }

</bundles_post_ra>
